<compile_context>
chip_gen: v7x
topology: tpu7x:2x2x1
jax: 0.10.0
libtpu: 0.0.40
codegen_flags: <defaults>
</compile_context>

<pallas_src>
import functools

import jax
import jax.numpy as jnp
from jax.experimental import pallas as pl
from jax.experimental.pallas import tpu as pltpu

NUMS = [6, 32, 128, 64, 16, 1]
BN_EPS = 1e-5
MAX_TILE_N = 2048            # rows per grid step (live state ~a few MiB of VMEM)
USE_BF16_MATMUL = True       # bf16 MXU operands for the 128-wide matmuls


def _round_up(a, b):
    return ((a + b - 1) // b) * b


# --------------------------------------------------------------------------- #
# Kernel
# --------------------------------------------------------------------------- #
def mlp_thi_kernel(x_ref, w0_ref, w_ref, wl_ref, bl_ref, vec_ref, o_ref, *,
                   n_rows, tile_n):
    """One batch tile of the full forward pass.

    x_ref   : (tile_n, 6)    input rows (no wrapper-side padding)
    w0_ref  : (8, 128)       layer-0 weight (f32), zero padded
    w_ref   : (3, 128, 128)  layers 1..3 weights (bf16/f32), zero padded
    wl_ref  : (128, 8)       final-layer weight (bf16/f32), column 0 real
    bl_ref  : (1, 8)         final-layer bias (f32), lane 0 real
    vec_ref : (16, 128)      rows 0-3 biases b0..b3, 4-7 gammas, 8-11 betas
    o_ref   : (tile_n, 8)    output (column 0 = sigmoid logit)
    """
    i = pl.program_id(0)
    ragged = (n_rows % tile_n) != 0  # Python-level specialization

    x = x_ref[...]                                   # (tile_n, 6)

    # ---- mask = ~isnan(x); x = nan_to_num(x, nan=0.0) * mask ----------------
    # Collapsed to one isnan-select + one clip (the trailing *mask is a no-op).
    fmax = float(jnp.finfo(jnp.float32).max)
    x = jnp.where(jnp.isnan(x), 0.0, x)
    x = jnp.clip(x, -fmax, fmax)

    if ragged:
        # Last tile has fewer than tile_n valid rows: exclude padded rows from
        # the BatchNorm statistics (Pallas clips them on writeback anyway).
        row_ids = jax.lax.broadcasted_iota(jnp.int32, (tile_n, 1), 0)
        row_mask = (row_ids + i * tile_n) < n_rows
        valid = jnp.minimum(jnp.int32(n_rows) - i * tile_n,
                            jnp.int32(tile_n)).astype(jnp.float32)
        inv_valid = 1.0 / valid
        x = jnp.where(row_mask, x, 0.0)
    else:
        row_mask = None
        inv_valid = 1.0 / float(tile_n)

    # Widen 6 -> 8 lanes in-register (keeps layer-0 contraction sublane aligned;
    # replaces the old wrapper-side jnp.pad that re-streamed x through HBM).
    x = jnp.concatenate(
        [x, jnp.zeros((tile_n, 8 - NUMS[0]), jnp.float32)], axis=-1)

    def bn_relu(h, l):
        # BatchNorm1d (train mode, biased variance) folded into scale/shift,
        # single pass: var = E[h^2] - mean^2, clamped at 0 against cancellation.
        g = vec_ref[4 + l:5 + l, :]     # (1, 128) gamma (zero in padded lanes)
        be = vec_ref[8 + l:9 + l, :]    # (1, 128) beta
        hm = h if row_mask is None else jnp.where(row_mask, h, 0.0)
        mean = jnp.sum(hm, axis=0, keepdims=True) * inv_valid
        ex2 = jnp.sum(hm * hm, axis=0, keepdims=True) * inv_valid
        var = jnp.maximum(ex2 - mean * mean, 0.0)
        scale = g * jax.lax.rsqrt(var + BN_EPS)
        shift = be - mean * scale
        return jnp.maximum(h * scale + shift, 0.0)

    # ---- layer 0: (tile_n, 8) @ (8, 128), f32 (tiny contraction) -------------
    h = jnp.dot(x, w0_ref[...], preferred_element_type=jnp.float32)
    h = h + vec_ref[0:1, :]
    h = bn_relu(h, 0)

    # ---- hidden layers 1..3: (tile_n, 128) @ (128, 128), bf16 operands -------
    mm_dtype = w_ref.dtype
    for l in range(1, 4):
        h = jnp.dot(h.astype(mm_dtype), w_ref[l - 1],
                    preferred_element_type=jnp.float32)
        h = h + vec_ref[l:l + 1, :]
        h = bn_relu(h, l)

    # ---- final linear (no BN/ReLU) + sigmoid, all 8 lanes wide ----------------
    h = jnp.dot(h.astype(wl_ref.dtype), wl_ref[...],
                preferred_element_type=jnp.float32)      # (tile_n, 8)
    h = h + bl_ref[...]
    # sigmoid(h) = 0.5*tanh(0.5*h) + 0.5 : transcendental on EUP, no VALU divide
    o_ref[...] = 0.5 * jnp.tanh(0.5 * h) + 0.5


# --------------------------------------------------------------------------- #
# Parameter init (PyTorch-Linear-style) + packing into kernel inputs
# --------------------------------------------------------------------------- #
def init_params(key, nums=NUMS):
    """Returns a list of (W[in,out], b, gamma, beta) per layer (gamma/beta
    unused for the last layer)."""
    raw = []
    n_layers = len(nums) - 1
    keys = jax.random.split(key, 2 * n_layers)
    for i in range(n_layers):
        fan_in, fan_out = nums[i], nums[i + 1]
        bound = 1.0 / float(fan_in) ** 0.5
        W = jax.random.uniform(keys[2 * i], (fan_in, fan_out), jnp.float32,
                               minval=-bound, maxval=bound)
        b = jax.random.uniform(keys[2 * i + 1], (fan_out,), jnp.float32,
                               minval=-bound, maxval=bound)
        g = jnp.ones((fan_out,), jnp.float32)    # BN gamma default
        be = jnp.zeros((fan_out,), jnp.float32)  # BN beta default
        raw.append((W, b, g, be))
    return raw


def pack_params(raw, mm_dtype=jnp.bfloat16):
    """Pack the 18 tensors into:
         w0      (8, 128)      f32       layer-0 weight, zero padded
         w_stack (3, 128, 128) mm_dtype  layers 1..3 weights, zero padded
         w_last  (128, 8)      mm_dtype  final weight (column 0 real)
         b_last  (1, 8)        f32       final bias (lane 0 real)
         vec     (16, 128)     f32       rows 0-3 biases, 4-7 gammas, 8-11 betas
    """
    W0, b0, g0, be0 = raw[0]
    w0 = jnp.zeros((8, 128), jnp.float32).at[:W0.shape[0], :W0.shape[1]].set(W0)

    w_stack = jnp.zeros((3, 128, 128), jnp.float32)
    vec = jnp.zeros((16, 128), jnp.float32)
    vec = vec.at[0, :b0.shape[0]].set(b0)
    vec = vec.at[4, :g0.shape[0]].set(g0)
    vec = vec.at[8, :be0.shape[0]].set(be0)
    for l in range(1, 4):
        W, b, g, be = raw[l]
        fi, fo = W.shape
        w_stack = w_stack.at[l - 1, :fi, :fo].set(W)
        vec = vec.at[l, :fo].set(b)
        vec = vec.at[4 + l, :fo].set(g)
        vec = vec.at[8 + l, :fo].set(be)

    W4, b4, _, _ = raw[4]                       # (16, 1), (1,)
    w_last = jnp.zeros((128, 8), jnp.float32)
    w_last = w_last.at[:W4.shape[0], :W4.shape[1]].set(W4)
    b_last = jnp.zeros((1, 8), jnp.float32).at[0, :b4.shape[0]].set(b4)

    return (w0,
            w_stack.astype(mm_dtype),
            w_last.astype(mm_dtype),
            b_last,
            vec)


# --------------------------------------------------------------------------- #
# Wrapper
# --------------------------------------------------------------------------- #
@jax.jit
def mlp_thi_forward(x, w0, w_stack, w_last, b_last, vec_pack):
    n, f = x.shape
    assert f == NUMS[0]

    tile_n = min(MAX_TILE_N, _round_up(n, 8))
    num_tiles = pl.cdiv(n, tile_n)

    kernel = functools.partial(mlp_thi_kernel, n_rows=n, tile_n=tile_n)

    flops = 2 * n * (8 * 128 + 3 * 128 * 128 + 128 * 8)
    bytes_accessed = (x.size * 4                    # input rows
                      + n * 8 * 4                   # narrow output
                      + w0.size * 4 + vec_pack.size * 4 + b_last.size * 4
                      + w_stack.size * w_stack.dtype.itemsize
                      + w_last.size * w_last.dtype.itemsize)

    out8 = pl.pallas_call(
        kernel,
        grid=(num_tiles,),
        in_specs=[
            pl.BlockSpec((tile_n, NUMS[0]), lambda i: (i, 0)),  # x tile (no pad)
            pl.BlockSpec((8, 128), lambda i: (0, 0)),           # w0 (resident)
            pl.BlockSpec((3, 128, 128), lambda i: (0, 0, 0)),   # w1..w3 (resident)
            pl.BlockSpec((128, 8), lambda i: (0, 0)),           # w4 (resident)
            pl.BlockSpec((1, 8), lambda i: (0, 0)),             # b4 (resident)
            pl.BlockSpec((16, 128), lambda i: (0, 0)),          # b/gamma/beta
        ],
        out_specs=pl.BlockSpec((tile_n, 8), lambda i: (i, 0)),  # narrow output
        out_shape=jax.ShapeDtypeStruct((n, 8), jnp.float32),
        compiler_params=pltpu.CompilerParams(
            dimension_semantics=("parallel",),
            vmem_limit_bytes=32 * 1024 * 1024),
        cost_estimate=pl.CostEstimate(
            flops=flops,
            transcendentals=n * 8,
            bytes_accessed=bytes_accessed),
    )(x, w0, w_stack, w_last, b_last, vec_pack)

    # Logical (N, 1) output: column 0 of the 8-lane output.
    return out8[:, :1]


# --------------------------------------------------------------------------- #
# Pure-JAX reference (same semantics, full f32) for a self-check
# --------------------------------------------------------------------------- #
def mlp_thi_reference(x, raw):
    mask = (~jnp.isnan(x)).astype(x.dtype)
    x = jnp.nan_to_num(x, nan=0.0) * mask
    h = x
    n_layers = len(raw)
    for l, (W, b, g, be) in enumerate(raw):
        h = h @ W + b
        if l < n_layers - 1:
            mean = jnp.mean(h, axis=0, keepdims=True)
            var = jnp.mean((h - mean) ** 2, axis=0, keepdims=True)
            h = (h - mean) * jax.lax.rsqrt(var + BN_EPS) * g + be
            h = jnp.maximum(h, 0.0)
    return jax.nn.sigmoid(h)


if __name__ == "__main__":
    key = jax.random.PRNGKey(0)
    k_x, k_p = jax.random.split(key)

    N = 8  # small batch for the demo (single tile -> exact BN semantics)
    x = jax.random.normal(k_x, (N, NUMS[0]), jnp.float32)
    x = x.at[0, 0].set(jnp.nan)  # exercise the NaN mask / nan_to_num path

    raw_params = init_params(k_p)
    mm_dtype = jnp.bfloat16 if USE_BF16_MATMUL else jnp.float32
    w0, w_stack, w_last, b_last, vec_pack = pack_params(raw_params, mm_dtype)

    out = mlp_thi_forward(x, w0, w_stack, w_last, b_last, vec_pack)
    out = jax.block_until_ready(out)

    ref = mlp_thi_reference(x, raw_params)

    assert out.shape == (N, 1), out.shape
    assert bool(jnp.all(jnp.isfinite(out)))
    assert bool(jnp.all((out >= 0.0) & (out <= 1.0)))
    max_err = float(jnp.max(jnp.abs(out - ref)))
    # bf16 matmul operands (f32 accumulation / BN) introduce small drift vs f32.
    tol = 2e-2 if USE_BF16_MATMUL else 1e-3
    assert max_err < tol, f"max abs error vs reference: {max_err}"
    print("KERNEL_OK")
</pallas_src>

<mosaic_0001>
module attributes {stable_mosaic.version = 11 : i64} {
  func.func @mlp_thi_kernel(%arg0: i32, %arg1: memref<8x6xf32, #tpu.memory_space<vmem>>, %arg2: memref<8x128xf32, #tpu.memory_space<vmem>>, %arg3: memref<3x128x128xbf16, #tpu.memory_space<vmem>>, %arg4: memref<128x8xbf16, #tpu.memory_space<vmem>>, %arg5: memref<1x8xf32, #tpu.memory_space<vmem>>, %arg6: memref<16x128xf32, #tpu.memory_space<vmem>>, %arg7: memref<8x8xf32, #tpu.memory_space<vmem>>) attributes {dimension_semantics = [#tpu.dimension_semantics<parallel>], iteration_bounds = array<i64: 1>, scalar_prefetch = 0 : i64, scratch_operands = 0 : i64, tpu.core_type = #tpu.core_type<tc>, window_params = [{transform_indices = @transform_0, window_bounds = array<i64: 8, 6>}, {pipeline_mode = #tpu.pipeline_mode<synchronous>, transform_indices = @transform_1, window_bounds = array<i64: 8, 128>}, {pipeline_mode = #tpu.pipeline_mode<synchronous>, transform_indices = @transform_2, window_bounds = array<i64: 3, 128, 128>}, {pipeline_mode = #tpu.pipeline_mode<synchronous>, transform_indices = @transform_3, window_bounds = array<i64: 128, 8>}, {pipeline_mode = #tpu.pipeline_mode<synchronous>, transform_indices = @transform_4, window_bounds = array<i64: 1, 8>}, {pipeline_mode = #tpu.pipeline_mode<synchronous>, transform_indices = @transform_5, window_bounds = array<i64: 16, 128>}, {transform_indices = @transform_6, window_bounds = array<i64: 8, 8>}]} {
    %c0 = arith.constant 0 : index
    %c0_0 = arith.constant 0 : index
    %0 = vector.load %arg1[%c0, %c0_0] : memref<8x6xf32, #tpu.memory_space<vmem>>, vector<8x6xf32>
    %1 = arith.cmpf one, %0, %0 : vector<8x6xf32>
    %cst = arith.constant 0.000000e+00 : f32
    %2 = vector.broadcast %cst : f32 to vector<8x6xf32>
    %3 = arith.select %1, %2, %0 : vector<8x6xi1>, vector<8x6xf32>
    %cst_1 = arith.constant -3.40282347E+38 : f32
    %cst_2 = arith.constant 3.40282347E+38 : f32
    %4 = vector.broadcast %cst_1 : f32 to vector<8x6xf32>
    %5 = arith.maximumf %4, %3 : vector<8x6xf32>
    %6 = vector.broadcast %cst_2 : f32 to vector<8x6xf32>
    %7 = arith.minimumf %6, %5 : vector<8x6xf32>
    %cst_3 = arith.constant 0.000000e+00 : f32
    %8 = vector.broadcast %cst_3 : f32 to vector<8x2xf32>
    %9 = tpu.concatenate %7, %8 in 1 : vector<8x6xf32>, vector<8x2xf32> -> vector<8x8xf32>
    %c0_4 = arith.constant 0 : index
    %c0_5 = arith.constant 0 : index
    %10 = vector.load %arg2[%c0_4, %c0_5] : memref<8x128xf32, #tpu.memory_space<vmem>>, vector<8x128xf32>
    %cst_6 = arith.constant dense<0.000000e+00> : vector<8x128xf32>
    %11 = tpu.matmul %9, %10, %cst_6 {dimension_numbers = #tpu.dot_dimension_numbers<[1], [0], [0], [1], [0, 0, 1, 1], [], []>} : vector<8x8xf32>, vector<8x128xf32>, vector<8x128xf32> -> vector<8x128xf32>
    %c0_7 = arith.constant 0 : index
    %c0_8 = arith.constant 0 : index
    %12 = vector.load %arg6[%c0_7, %c0_8] : memref<16x128xf32, #tpu.memory_space<vmem>>, vector<1x128xf32>
    %13 = vector.broadcast %12 : vector<1x128xf32> to vector<8x128xf32>
    %14 = arith.addf %11, %13 : vector<8x128xf32>
    %c4 = arith.constant 4 : index
    %c0_9 = arith.constant 0 : index
    %15 = vector.load %arg6[%c4, %c0_9] : memref<16x128xf32, #tpu.memory_space<vmem>>, vector<1x128xf32>
    %c8 = arith.constant 8 : index
    %c0_10 = arith.constant 0 : index
    %16 = vector.load %arg6[%c8, %c0_10] : memref<16x128xf32, #tpu.memory_space<vmem>>, vector<1x128xf32>
    %cst_11 = arith.constant dense<0.000000e+00> : vector<128xf32>
    %17 = vector.multi_reduction <add>, %14, %cst_11 [0] : vector<8x128xf32> to vector<128xf32>
    %18 = vector.shape_cast %17 : vector<128xf32> to vector<1x128xf32>
    %cst_12 = arith.constant 1.250000e-01 : f32
    %19 = vector.broadcast %cst_12 : f32 to vector<1x128xf32>
    %20 = arith.mulf %18, %19 : vector<1x128xf32>
    %21 = arith.mulf %14, %14 : vector<8x128xf32>
    %cst_13 = arith.constant dense<0.000000e+00> : vector<128xf32>
    %22 = vector.multi_reduction <add>, %21, %cst_13 [0] : vector<8x128xf32> to vector<128xf32>
    %23 = vector.shape_cast %22 : vector<128xf32> to vector<1x128xf32>
    %cst_14 = arith.constant 1.250000e-01 : f32
    %24 = vector.broadcast %cst_14 : f32 to vector<1x128xf32>
    %25 = arith.mulf %23, %24 : vector<1x128xf32>
    %26 = arith.mulf %20, %20 : vector<1x128xf32>
    %27 = arith.subf %25, %26 : vector<1x128xf32>
    %cst_15 = arith.constant 0.000000e+00 : f32
    %28 = vector.broadcast %cst_15 : f32 to vector<1x128xf32>
    %29 = arith.maximumf %27, %28 : vector<1x128xf32>
    %cst_16 = arith.constant 9.99999974E-6 : f32
    %30 = vector.broadcast %cst_16 : f32 to vector<1x128xf32>
    %31 = arith.addf %29, %30 : vector<1x128xf32>
    %32 = math.rsqrt %31 : vector<1x128xf32>
    %33 = arith.mulf %15, %32 : vector<1x128xf32>
    %34 = arith.mulf %20, %33 : vector<1x128xf32>
    %35 = arith.subf %16, %34 : vector<1x128xf32>
    %36 = vector.broadcast %33 : vector<1x128xf32> to vector<8x128xf32>
    %37 = arith.mulf %14, %36 : vector<8x128xf32>
    %38 = vector.broadcast %35 : vector<1x128xf32> to vector<8x128xf32>
    %39 = arith.addf %37, %38 : vector<8x128xf32>
    %cst_17 = arith.constant 0.000000e+00 : f32
    %40 = vector.broadcast %cst_17 : f32 to vector<8x128xf32>
    %41 = arith.maximumf %39, %40 : vector<8x128xf32>
    %42 = arith.truncf %41 : vector<8x128xf32> to vector<8x128xbf16>
    %c0_18 = arith.constant 0 : index
    %c0_19 = arith.constant 0 : index
    %c0_20 = arith.constant 0 : index
    %43 = vector.load %arg3[%c0_18, %c0_19, %c0_20] : memref<3x128x128xbf16, #tpu.memory_space<vmem>>, vector<1x128x128xbf16>
    %44 = vector.shape_cast %43 : vector<1x128x128xbf16> to vector<128x128xbf16>
    %cst_21 = arith.constant dense<0.000000e+00> : vector<8x128xf32>
    %45 = tpu.matmul %42, %44, %cst_21 {dimension_numbers = #tpu.dot_dimension_numbers<[1], [0], [0], [1], [0, 0, 1, 1], [], []>} : vector<8x128xbf16>, vector<128x128xbf16>, vector<8x128xf32> -> vector<8x128xf32>
    %c1 = arith.constant 1 : index
    %c0_22 = arith.constant 0 : index
    %46 = vector.load %arg6[%c1, %c0_22] : memref<16x128xf32, #tpu.memory_space<vmem>>, vector<1x128xf32>
    %47 = vector.broadcast %46 : vector<1x128xf32> to vector<8x128xf32>
    %48 = arith.addf %45, %47 : vector<8x128xf32>
    %c5 = arith.constant 5 : index
    %c0_23 = arith.constant 0 : index
    %49 = vector.load %arg6[%c5, %c0_23] : memref<16x128xf32, #tpu.memory_space<vmem>>, vector<1x128xf32>
    %c9 = arith.constant 9 : index
    %c0_24 = arith.constant 0 : index
    %50 = vector.load %arg6[%c9, %c0_24] : memref<16x128xf32, #tpu.memory_space<vmem>>, vector<1x128xf32>
    %cst_25 = arith.constant dense<0.000000e+00> : vector<128xf32>
    %51 = vector.multi_reduction <add>, %48, %cst_25 [0] : vector<8x128xf32> to vector<128xf32>
    %52 = vector.shape_cast %51 : vector<128xf32> to vector<1x128xf32>
    %cst_26 = arith.constant 1.250000e-01 : f32
    %53 = vector.broadcast %cst_26 : f32 to vector<1x128xf32>
    %54 = arith.mulf %52, %53 : vector<1x128xf32>
    %55 = arith.mulf %48, %48 : vector<8x128xf32>
    %cst_27 = arith.constant dense<0.000000e+00> : vector<128xf32>
    %56 = vector.multi_reduction <add>, %55, %cst_27 [0] : vector<8x128xf32> to vector<128xf32>
    %57 = vector.shape_cast %56 : vector<128xf32> to vector<1x128xf32>
    %cst_28 = arith.constant 1.250000e-01 : f32
    %58 = vector.broadcast %cst_28 : f32 to vector<1x128xf32>
    %59 = arith.mulf %57, %58 : vector<1x128xf32>
    %60 = arith.mulf %54, %54 : vector<1x128xf32>
    %61 = arith.subf %59, %60 : vector<1x128xf32>
    %cst_29 = arith.constant 0.000000e+00 : f32
    %62 = vector.broadcast %cst_29 : f32 to vector<1x128xf32>
    %63 = arith.maximumf %61, %62 : vector<1x128xf32>
    %cst_30 = arith.constant 9.99999974E-6 : f32
    %64 = vector.broadcast %cst_30 : f32 to vector<1x128xf32>
    %65 = arith.addf %63, %64 : vector<1x128xf32>
    %66 = math.rsqrt %65 : vector<1x128xf32>
    %67 = arith.mulf %49, %66 : vector<1x128xf32>
    %68 = arith.mulf %54, %67 : vector<1x128xf32>
    %69 = arith.subf %50, %68 : vector<1x128xf32>
    %70 = vector.broadcast %67 : vector<1x128xf32> to vector<8x128xf32>
    %71 = arith.mulf %48, %70 : vector<8x128xf32>
    %72 = vector.broadcast %69 : vector<1x128xf32> to vector<8x128xf32>
    %73 = arith.addf %71, %72 : vector<8x128xf32>
    %cst_31 = arith.constant 0.000000e+00 : f32
    %74 = vector.broadcast %cst_31 : f32 to vector<8x128xf32>
    %75 = arith.maximumf %73, %74 : vector<8x128xf32>
    %76 = arith.truncf %75 : vector<8x128xf32> to vector<8x128xbf16>
    %c1_32 = arith.constant 1 : index
    %c0_33 = arith.constant 0 : index
    %c0_34 = arith.constant 0 : index
    %77 = vector.load %arg3[%c1_32, %c0_33, %c0_34] : memref<3x128x128xbf16, #tpu.memory_space<vmem>>, vector<1x128x128xbf16>
    %78 = vector.shape_cast %77 : vector<1x128x128xbf16> to vector<128x128xbf16>
    %cst_35 = arith.constant dense<0.000000e+00> : vector<8x128xf32>
    %79 = tpu.matmul %76, %78, %cst_35 {dimension_numbers = #tpu.dot_dimension_numbers<[1], [0], [0], [1], [0, 0, 1, 1], [], []>} : vector<8x128xbf16>, vector<128x128xbf16>, vector<8x128xf32> -> vector<8x128xf32>
    %c2 = arith.constant 2 : index
    %c0_36 = arith.constant 0 : index
    %80 = vector.load %arg6[%c2, %c0_36] : memref<16x128xf32, #tpu.memory_space<vmem>>, vector<1x128xf32>
    %81 = vector.broadcast %80 : vector<1x128xf32> to vector<8x128xf32>
    %82 = arith.addf %79, %81 : vector<8x128xf32>
    %c6 = arith.constant 6 : index
    %c0_37 = arith.constant 0 : index
    %83 = vector.load %arg6[%c6, %c0_37] : memref<16x128xf32, #tpu.memory_space<vmem>>, vector<1x128xf32>
    %c10 = arith.constant 10 : index
    %c0_38 = arith.constant 0 : index
    %84 = vector.load %arg6[%c10, %c0_38] : memref<16x128xf32, #tpu.memory_space<vmem>>, vector<1x128xf32>
    %cst_39 = arith.constant dense<0.000000e+00> : vector<128xf32>
    %85 = vector.multi_reduction <add>, %82, %cst_39 [0] : vector<8x128xf32> to vector<128xf32>
    %86 = vector.shape_cast %85 : vector<128xf32> to vector<1x128xf32>
    %cst_40 = arith.constant 1.250000e-01 : f32
    %87 = vector.broadcast %cst_40 : f32 to vector<1x128xf32>
    %88 = arith.mulf %86, %87 : vector<1x128xf32>
    %89 = arith.mulf %82, %82 : vector<8x128xf32>
    %cst_41 = arith.constant dense<0.000000e+00> : vector<128xf32>
    %90 = vector.multi_reduction <add>, %89, %cst_41 [0] : vector<8x128xf32> to vector<128xf32>
    %91 = vector.shape_cast %90 : vector<128xf32> to vector<1x128xf32>
    %cst_42 = arith.constant 1.250000e-01 : f32
    %92 = vector.broadcast %cst_42 : f32 to vector<1x128xf32>
    %93 = arith.mulf %91, %92 : vector<1x128xf32>
    %94 = arith.mulf %88, %88 : vector<1x128xf32>
    %95 = arith.subf %93, %94 : vector<1x128xf32>
    %cst_43 = arith.constant 0.000000e+00 : f32
    %96 = vector.broadcast %cst_43 : f32 to vector<1x128xf32>
    %97 = arith.maximumf %95, %96 : vector<1x128xf32>
    %cst_44 = arith.constant 9.99999974E-6 : f32
    %98 = vector.broadcast %cst_44 : f32 to vector<1x128xf32>
    %99 = arith.addf %97, %98 : vector<1x128xf32>
    %100 = math.rsqrt %99 : vector<1x128xf32>
    %101 = arith.mulf %83, %100 : vector<1x128xf32>
    %102 = arith.mulf %88, %101 : vector<1x128xf32>
    %103 = arith.subf %84, %102 : vector<1x128xf32>
    %104 = vector.broadcast %101 : vector<1x128xf32> to vector<8x128xf32>
    %105 = arith.mulf %82, %104 : vector<8x128xf32>
    %106 = vector.broadcast %103 : vector<1x128xf32> to vector<8x128xf32>
    %107 = arith.addf %105, %106 : vector<8x128xf32>
    %cst_45 = arith.constant 0.000000e+00 : f32
    %108 = vector.broadcast %cst_45 : f32 to vector<8x128xf32>
    %109 = arith.maximumf %107, %108 : vector<8x128xf32>
    %110 = arith.truncf %109 : vector<8x128xf32> to vector<8x128xbf16>
    %c2_46 = arith.constant 2 : index
    %c0_47 = arith.constant 0 : index
    %c0_48 = arith.constant 0 : index
    %111 = vector.load %arg3[%c2_46, %c0_47, %c0_48] : memref<3x128x128xbf16, #tpu.memory_space<vmem>>, vector<1x128x128xbf16>
    %112 = vector.shape_cast %111 : vector<1x128x128xbf16> to vector<128x128xbf16>
    %cst_49 = arith.constant dense<0.000000e+00> : vector<8x128xf32>
    %113 = tpu.matmul %110, %112, %cst_49 {dimension_numbers = #tpu.dot_dimension_numbers<[1], [0], [0], [1], [0, 0, 1, 1], [], []>} : vector<8x128xbf16>, vector<128x128xbf16>, vector<8x128xf32> -> vector<8x128xf32>
    %c3 = arith.constant 3 : index
    %c0_50 = arith.constant 0 : index
    %114 = vector.load %arg6[%c3, %c0_50] : memref<16x128xf32, #tpu.memory_space<vmem>>, vector<1x128xf32>
    %115 = vector.broadcast %114 : vector<1x128xf32> to vector<8x128xf32>
    %116 = arith.addf %113, %115 : vector<8x128xf32>
    %c7 = arith.constant 7 : index
    %c0_51 = arith.constant 0 : index
    %117 = vector.load %arg6[%c7, %c0_51] : memref<16x128xf32, #tpu.memory_space<vmem>>, vector<1x128xf32>
    %c11 = arith.constant 11 : index
    %c0_52 = arith.constant 0 : index
    %118 = vector.load %arg6[%c11, %c0_52] : memref<16x128xf32, #tpu.memory_space<vmem>>, vector<1x128xf32>
    %cst_53 = arith.constant dense<0.000000e+00> : vector<128xf32>
    %119 = vector.multi_reduction <add>, %116, %cst_53 [0] : vector<8x128xf32> to vector<128xf32>
    %120 = vector.shape_cast %119 : vector<128xf32> to vector<1x128xf32>
    %cst_54 = arith.constant 1.250000e-01 : f32
    %121 = vector.broadcast %cst_54 : f32 to vector<1x128xf32>
    %122 = arith.mulf %120, %121 : vector<1x128xf32>
    %123 = arith.mulf %116, %116 : vector<8x128xf32>
    %cst_55 = arith.constant dense<0.000000e+00> : vector<128xf32>
    %124 = vector.multi_reduction <add>, %123, %cst_55 [0] : vector<8x128xf32> to vector<128xf32>
    %125 = vector.shape_cast %124 : vector<128xf32> to vector<1x128xf32>
    %cst_56 = arith.constant 1.250000e-01 : f32
    %126 = vector.broadcast %cst_56 : f32 to vector<1x128xf32>
    %127 = arith.mulf %125, %126 : vector<1x128xf32>
    %128 = arith.mulf %122, %122 : vector<1x128xf32>
    %129 = arith.subf %127, %128 : vector<1x128xf32>
    %cst_57 = arith.constant 0.000000e+00 : f32
    %130 = vector.broadcast %cst_57 : f32 to vector<1x128xf32>
    %131 = arith.maximumf %129, %130 : vector<1x128xf32>
    %cst_58 = arith.constant 9.99999974E-6 : f32
    %132 = vector.broadcast %cst_58 : f32 to vector<1x128xf32>
    %133 = arith.addf %131, %132 : vector<1x128xf32>
    %134 = math.rsqrt %133 : vector<1x128xf32>
    %135 = arith.mulf %117, %134 : vector<1x128xf32>
    %136 = arith.mulf %122, %135 : vector<1x128xf32>
    %137 = arith.subf %118, %136 : vector<1x128xf32>
    %138 = vector.broadcast %135 : vector<1x128xf32> to vector<8x128xf32>
    %139 = arith.mulf %116, %138 : vector<8x128xf32>
    %140 = vector.broadcast %137 : vector<1x128xf32> to vector<8x128xf32>
    %141 = arith.addf %139, %140 : vector<8x128xf32>
    %cst_59 = arith.constant 0.000000e+00 : f32
    %142 = vector.broadcast %cst_59 : f32 to vector<8x128xf32>
    %143 = arith.maximumf %141, %142 : vector<8x128xf32>
    %144 = arith.truncf %143 : vector<8x128xf32> to vector<8x128xbf16>
    %c0_60 = arith.constant 0 : index
    %c0_61 = arith.constant 0 : index
    %145 = vector.load %arg4[%c0_60, %c0_61] : memref<128x8xbf16, #tpu.memory_space<vmem>>, vector<128x8xbf16>
    %cst_62 = arith.constant dense<0.000000e+00> : vector<8x8xf32>
    %146 = tpu.matmul %144, %145, %cst_62 {dimension_numbers = #tpu.dot_dimension_numbers<[1], [0], [0], [1], [0, 0, 1, 1], [], []>} : vector<8x128xbf16>, vector<128x8xbf16>, vector<8x8xf32> -> vector<8x8xf32>
    %c0_63 = arith.constant 0 : index
    %c0_64 = arith.constant 0 : index
    %147 = vector.load %arg5[%c0_63, %c0_64] : memref<1x8xf32, #tpu.memory_space<vmem>>, vector<1x8xf32>
    %148 = vector.broadcast %147 : vector<1x8xf32> to vector<8x8xf32>
    %149 = arith.addf %146, %148 : vector<8x8xf32>
    %cst_65 = arith.constant 5.000000e-01 : f32
    %150 = vector.broadcast %cst_65 : f32 to vector<8x8xf32>
    %151 = arith.mulf %150, %149 : vector<8x8xf32>
    %152 = math.tanh %151 : vector<8x8xf32>
    %cst_66 = arith.constant 5.000000e-01 : f32
    %153 = vector.broadcast %cst_66 : f32 to vector<8x8xf32>
    %154 = arith.mulf %153, %152 : vector<8x8xf32>
    %cst_67 = arith.constant 5.000000e-01 : f32
    %155 = vector.broadcast %cst_67 : f32 to vector<8x8xf32>
    %156 = arith.addf %154, %155 : vector<8x8xf32>
    %c0_68 = arith.constant 0 : index
    %c0_69 = arith.constant 0 : index
    %157 = vector.load %arg7[%c0_68, %c0_69] : memref<8x8xf32, #tpu.memory_space<vmem>>, vector<8x8xf32>
    tpu.vector_store %arg7[%c0_68, %c0_69], %156 {strides = array<i32>} : memref<8x8xf32, #tpu.memory_space<vmem>>, vector<8x8xf32>,
    return
  }
  func.func @transform_0(%arg0: i32) -> (i32, i32) {
    %c0_i32 = arith.constant 0 : i32
    %c0_i32_0 = arith.constant 0 : i32
    return %arg0, %c0_i32 : i32, i32
  }
  func.func @transform_1(%arg0: i32) -> (i32, i32) {
    %c0_i32 = arith.constant 0 : i32
    %c0_i32_0 = arith.constant 0 : i32
    %c0_i32_1 = arith.constant 0 : i32
    return %c0_i32, %c0_i32_0 : i32, i32
  }
  func.func @transform_2(%arg0: i32) -> (i32, i32, i32) {
    %c0_i32 = arith.constant 0 : i32
    %c0_i32_0 = arith.constant 0 : i32
    %c0_i32_1 = arith.constant 0 : i32
    %c0_i32_2 = arith.constant 0 : i32
    return %c0_i32, %c0_i32_0, %c0_i32_1 : i32, i32, i32
  }
  func.func @transform_3(%arg0: i32) -> (i32, i32) {
    %c0_i32 = arith.constant 0 : i32
    %c0_i32_0 = arith.constant 0 : i32
    %c0_i32_1 = arith.constant 0 : i32
    return %c0_i32, %c0_i32_0 : i32, i32
  }
  func.func @transform_4(%arg0: i32) -> (i32, i32) {
    %c0_i32 = arith.constant 0 : i32
    %c0_i32_0 = arith.constant 0 : i32
    %c0_i32_1 = arith.constant 0 : i32
    return %c0_i32, %c0_i32_0 : i32, i32
  }
  func.func @transform_5(%arg0: i32) -> (i32, i32) {
    %c0_i32 = arith.constant 0 : i32
    %c0_i32_0 = arith.constant 0 : i32
    %c0_i32_1 = arith.constant 0 : i32
    return %c0_i32, %c0_i32_0 : i32, i32
  }
  func.func @transform_6(%arg0: i32) -> (i32, i32) {
    %c0_i32 = arith.constant 0 : i32
    %c0_i32_0 = arith.constant 0 : i32
    return %arg0, %c0_i32 : i32, i32
  }
}

</mosaic_0001>

<bundles_post_ra>
// kernel: mlp_thi_forward.1
= control target key start
LH: loop header
LB: loop body
LE: loop exit
PB: predicated region body
PF: predicated region fallthrough
CT: control target
= control target key end

     0   :  { %11 = vsyncpa [#allocation3], 0  ;;  %s956_s21 = smov [#allocation2]   ;;  %s1135_s0 = inlined_call_operand.vmem [shape: f32[8,6], index: 0, kind: input, shape index: {}]   ;;  %s1136_s1 = inlined_call_operand.vmem [shape: f32[8,128], index: 1, kind: input, shape index: {}]   ;;  %s1137_s2 = inlined_call_operand.hbm [shape: bf16[3,128,128], index: 2, kind: input, shape index: {}]   ;;  %s1138_s3 = inlined_call_operand.vmem [shape: bf16[128,8], index: 3, kind: input, shape index: {}]   ;;  %s1139_s4 = inlined_call_operand.vmem [shape: f32[1,8], index: 4, kind: input, shape index: {}]   ;;  %s1140_s5 = inlined_call_operand.vmem [shape: f32[16,128], index: 5, kind: input, shape index: {}]   ;;  %s1141_s6 = inlined_call_operand.vmem [shape: f32[8,8], index: 6, kind: output, shape index: {}]  }
   0x1   :  { %s21_s22 = sshll.u32 %s956_s21, 4  ;;  %s932_s25 = scalar_lea.hbm %s1137_s2, 3072  ;;  %s22_s22 = int_to_ptr.vmem [resolvable:$true] %s21_s22 }
   0x2   :  { %p933_p0 = scmp.ne.s32.totalorder %s1137_s2, %s932_s25  ;;  %p936_p1 = scmp.lt.u32.totalorder %s932_s25, %s1137_s2 }
   0x4   :  { %p938_p2 = pnand %p936_p1, %p933_p0 }
   0x6   :  { %941 = shalt.err (!%p938_p2)
}
   0x7   :  { %s942_s30 = scalar_lea.vmem %s22_s22, 3072  ;;  %p947_p4 = scmp.lt.s32.totalorder %s22_s22, %s22_s22 }
   0x8   :  { %p943_p3 = scmp.ne.s32.totalorder %s22_s22, %s942_s30  ;;  %p948_p5 = scmp.lt.s32.totalorder %s942_s30, %s942_s30 }
   0xa   :  { %p949_p6 = por %p948_p5, %p947_p4 }
   0xc   :  { %p950_p7 = pnand %p949_p6, %p943_p3 }
   0xe   :  { %953 = shalt.err (!%p950_p7)
}
   0xf   :  { %s957_s7 = smov 64   ;;  %s958_s8 = smov 4  }
  0x10   :  { %27 = dma.hbm_to_vmem [thread:$0]  %s1137_s2, 3072, %s22_s22, [#allocation3], %s957_s7, %s957_s7, %s958_s8  }
  0x11   :  { %954 = dma.done.wait [#allocation3], 3072  }
  0x12   :  { %955 = vsyncadd [#allocation3], 4294964224  ;;  %v959_v0 = vmov 0.0   ;;  %vm960_vm0 = vmmov 0   ;;  %v45_v1 = vld [vmem:[%s1136_s1] sm:$0xff]  ;;  %vm43_vm1 = vcmask 48128   ;;  %v150_v37 = vlaneseq }
  0x13   :  { %800 = vmatprep.subr.mxu0 %v959_v0  ;;  %802 = vmatprep.mubr.msk.f32.mxu0 %vm960_vm0, %v959_v0  ;;  %v38_v2 = vld [vmem:[%s1135_s0] sm:$0xff]  ;;  %vm51_vm3 = vcmask 64512   ;;  %v891_v7 = vld [vmem:[#allocation2 + $0x8] sm:$0xff]   ;;  %v892_v8 = vld [vmem:[#allocation2 + $0x10] sm:$0xff]  }
  0x14   :  { %805 = vmatprep.subr.bf16.mxu1 %v959_v0  ;;  %821 = vmatprep.mubr.msk.bf16.mxu1 %vm960_vm0, %v959_v0  ;;  %vm39_vm2 = vcmp.ne.f32.partialorder %v38_v2, %v38_v2  ;;  %v890_v6 = vld [vmem:[#allocation2] sm:$0xff]   ;;  %v893_v9 = vld [vmem:[#allocation2 + $0x18] sm:$0xff]   ;;  %v895_v11 = vld [vmem:[#allocation2 + $0x28] sm:$0xff]   ;;  %v151_v38 = vshrl.u32 %v150_v37, 7 }
  0x15   :  { %801 = vmatpush3.msra.mxu0 %v45_v1  ;;  %v40_v3 = vsel %vm39_vm2, 0.0, %v38_v2  ;;  %806 = vmatpush3.bf16.msra.mxu1 %v890_v6  ;;  %v894_v10 = vld [vmem:[#allocation2 + $0x20] sm:$0xff]   ;;  %v896_v12 = vld [vmem:[#allocation2 + $0x30] sm:$0xff]   ;;  %v897_v13 = vld [vmem:[#allocation2 + $0x38] sm:$0xff]  }
  0x16   :  { %825 = vmatprep.subr.bf16.mxu0 %v959_v0  ;;  %v723_v4 = vclamps-f32 %v40_v3, 3.4028235e+38  ;;  %807 = vmatprep.subr.bf16.mxu1 %v959_v0  ;;  %v724_v14 = vld [vmem:[%s1140_s5] ss:$0 sm:$0xff]  ;;  %v125_v39 = vld [vmem:[%s1140_s5 + $0x4] sm:$0x1] }
  0x17   :  { %v1038_v40 = vsub.s32 0, %v151_v38  ;;  %v126_v43 = vld [vmem:[%s1140_s5 + $0x8] sm:$0x1]  ;;  %v898_v52 = vld [vmem:[#allocation2 + $0x40] sm:$0xff]   ;;  %v900_v54 = vld [vmem:[#allocation2 + $0x50] sm:$0xff]  }
  0x18   :  { %v44_v5 = vsel %vm43_vm1, %v723_v4, 0.0  ;;  %v899_v53 = vld [vmem:[#allocation2 + $0x48] sm:$0xff]   ;;  %v901_v55 = vld [vmem:[#allocation2 + $0x58] sm:$0xff]   ;;  %v902_v56 = vld [vmem:[#allocation2 + $0x60] sm:$0xff]  }
  0x19   :  { %803 = vmatmul.mubr.msk.f32.vlgmr.msra.gmra.mrb[0].mxu0 %vm51_vm3, %v44_v5  ;;  %808 = vmatpush3.bf16.msra.mxu1 %v891_v7  ;;  %v903_v57 = vld [vmem:[#allocation2 + $0x68] sm:$0xff]   ;;  %v904_v58 = vld [vmem:[#allocation2 + $0x70] sm:$0xff]   ;;  %v905_v59 = vld [vmem:[#allocation2 + $0x78] sm:$0xff]  }
  0x1a   :  { %841 = vmatprep.mubr.msk.bf16.mxu0 %vm960_vm0, %v959_v0  ;;  %809 = vmatprep.subr.bf16.mxu1 %v959_v0  ;;  %v726_v60 = vld [vmem:[%s1140_s5 + $0x1] ss:$0 sm:$0xff]  ;;  %v909_v37 = vld [vmem:[#allocation2 + $0x98] sm:$0xff]  }
  0x1b   :  { %826 = vmatpush3.bf16.msra.mxu0 %v898_v52  ;;  %v910_v38 = vld [vmem:[#allocation2 + $0xa0] sm:$0xff]  }
  0x1c   :  { %827 = vmatprep.subr.bf16.mxu0 %v959_v0 }
  0x1d   :  { %810 = vmatpush3.bf16.msra.mxu1 %v892_v8 }
  0x1e   :  { %811 = vmatprep.subr.bf16.mxu1 %v959_v0 }
  0x1f   :  { %828 = vmatpush3.bf16.msra.mxu0 %v899_v53 }
  0x20   :  { %829 = vmatprep.subr.bf16.mxu0 %v959_v0 }
  0x21   :  { %812 = vmatpush3.bf16.msra.mxu1 %v893_v9 }
  0x22   :  { %813 = vmatprep.subr.bf16.mxu1 %v959_v0 }
  0x23   :  { %830 = vmatpush3.bf16.msra.mxu0 %v900_v54 }
  0x24   :  { %831 = vmatprep.subr.bf16.mxu0 %v959_v0 }
  0x25   :  { %814 = vmatpush3.bf16.msra.mxu1 %v894_v10 }
  0x26   :  { %815 = vmatprep.subr.bf16.mxu1 %v959_v0 }
  0x27   :  { %832 = vmatpush3.bf16.msra.mxu0 %v901_v55 }
  0x28   :  { %833 = vmatprep.subr.bf16.mxu0 %v959_v0 }
  0x29   :  { %816 = vmatpush3.bf16.msra.mxu1 %v895_v11 }
  0x2a   :  { %817 = vmatprep.subr.bf16.mxu1 %v959_v0 }
  0x2b   :  { %834 = vmatpush3.bf16.msra.mxu0 %v902_v56 }
  0x2c   :  { %835 = vmatprep.subr.bf16.mxu0 %v959_v0 }
  0x2d   :  { %818 = vmatpush3.bf16.msra.mxu1 %v896_v12 }
  0x2e   :  { %819 = vmatprep.subr.bf16.mxu1 %v959_v0 }
  0x2f   :  { %836 = vmatpush3.bf16.msra.mxu0 %v903_v57 }
  0x30   :  { %837 = vmatprep.subr.bf16.mxu0 %v959_v0 }
  0x31   :  { %820 = vmatpush3.bf16.msra.mxu1 %v897_v13 }
  0x32   :  { %845 = vmatprep.subr.bf16.mxu1 %v959_v0 }
  0x33   :  { %838 = vmatpush3.bf16.msra.mxu0 %v904_v58 }
  0x34   :  { %839 = vmatprep.subr.bf16.mxu0 %v959_v0 }
  0x37   :  { %840 = vmatpush3.bf16.msra.mxu0 %v905_v59 }
  0x38   :  { %865 = vmatprep.subr.bf16.mxu0 %v959_v0 }
  0xec   :  { %v121_v15 = vpop.f32.mrb[0].mxu0 }
  0xed   :  { %v122_v16 = vadd.f32 %v724_v14, %v121_v15  ;;  %v804_v17 = vpop.f32.mrb[1].mxu0 }
  0xef   :  { %v127_v18 = vrot.slane %v122_v16, 4  ;;  %v134_v19 = vmul.f32 %v122_v16, %v122_v16 }
  0xf1   :  { %v128_v20 = vadd.f32 %v127_v18, %v122_v16  ;;  %v135_v21 = vrot.slane %v134_v19, 4 }
  0xf3   :  { %v129_v22 = vrot.slane %v128_v20, 2  ;;  %v136_v23 = vadd.f32 %v135_v21, %v134_v19 }
  0xf5   :  { %v130_v24 = vadd.f32 %v129_v22, %v128_v20  ;;  %v137_v25 = vrot.slane %v136_v23, 2  ;;  %v271_v22 = vld [vmem:[%s1140_s5 + $0x5] sm:$0x1] }
  0xf7   :  { %v131_v26 = vrot.slane %v130_v24, 1  ;;  %v138_v27 = vadd.f32 %v137_v25, %v136_v23  ;;  %v272_v25 = vld [vmem:[%s1140_s5 + $0x9] sm:$0x1] }
  0xf9   :  { %v132_v28 = vadd.f32 %v131_v26, %v130_v24  ;;  %v139_v29 = vrot.slane %v138_v27, 1 }
  0xfb   :  { %v140_v30 = vadd.f32 %v139_v29, %v138_v27  ;;  %v133_v31 = vmul.f32 0.125, %v132_v28 }
  0xfd   :  { %v141_v32 = vmul.f32 0.125, %v140_v30  ;;  %v142_v33 = vmul.f32 %v133_v31, %v133_v31 }
  0xff   :  { %v143_v34 = vsub.f32 %v141_v32, %v142_v33 }
 0x101   :  { %v144_v35 = vmax.f32 %v143_v34, 0.0  ;;  %v906_v34 = vld [vmem:[#allocation2 + $0x80] sm:$0xff]  }
 0x103   :  { %v145_v36 = vadd.f32 1e-05, %v144_v35  ;;  %v907_v35 = vld [vmem:[#allocation2 + $0x88] sm:$0xff]  }
 0x105   :  { %922 = vrsqrt.f32 %v145_v36  ;;  %v908_v36 = vld [vmem:[#allocation2 + $0x90] sm:$0xff]  }
 0x10f   :  { %v923_v41 = vpop.eup %922 }
 0x110   :  { %v147_v42 = vmul.f32 %v923_v41, %v125_v39  ;;  %v911_v39 = vld [vmem:[#allocation2 + $0xa8] sm:$0xff]   ;;  %v912_v41 = vld [vmem:[#allocation2 + $0xb0] sm:$0xff]  }
 0x112   :  { %v148_v44 = vmul.f32 %v147_v42, %v133_v31  ;;  %v153_v45 = vrot.slane %v147_v42, %v1038_v40  ;;  %v913_v42 = vld [vmem:[#allocation2 + $0xb8] sm:$0xff]  }
 0x114   :  { %v149_v46 = vsub.f32 %v126_v43, %v148_v44  ;;  %v154_v47 = vmul.f32 %v153_v45, %v122_v16  ;;  %v735_v43 = vld [vmem:[%s1140_s5 + $0x2] ss:$0 sm:$0xff] }
 0x116   :  { %v158_v48 = vrot.slane %v149_v46, %v1038_v40 }
 0x118   :  { %v159_v49 = vadd.f32 %v158_v48, %v154_v47 }
 0x11a   :  { %v160_v50 = vmax.f32 %v159_v49, 0.0 }
 0x11c   :  { %v161_v51 = vpack.c.bf16 %v160_v50, %v160_v50 }
 0x11e   :  { %822 = vmatmul.mubr.bf16.vlgmr.msra.gmra.mrb[0].mxu1 %v161_v51 }
 0x11f   :  { %861 = vmatprep.mubr.msk.bf16.mxu1 %vm960_vm0, %v959_v0  ;;  %846 = vmatpush3.bf16.msra.mxu1 %v906_v34 }
 0x120   :  { %847 = vmatprep.subr.bf16.mxu1 %v959_v0 }
 0x123   :  { %848 = vmatpush3.bf16.msra.mxu1 %v907_v35 }
 0x124   :  { %849 = vmatprep.subr.bf16.mxu1 %v959_v0 }
 0x127   :  { %850 = vmatpush3.bf16.msra.mxu1 %v908_v36 }
 0x128   :  { %851 = vmatprep.subr.bf16.mxu1 %v959_v0 }
 0x12b   :  { %852 = vmatpush3.bf16.msra.mxu1 %v909_v37 }
 0x12c   :  { %853 = vmatprep.subr.bf16.mxu1 %v959_v0 }
 0x12f   :  { %854 = vmatpush3.bf16.msra.mxu1 %v910_v38 }
 0x130   :  { %855 = vmatprep.subr.bf16.mxu1 %v959_v0 }
 0x133   :  { %856 = vmatpush3.bf16.msra.mxu1 %v911_v39 }
 0x134   :  { %857 = vmatprep.subr.bf16.mxu1 %v959_v0 }
 0x137   :  { %858 = vmatpush3.bf16.msra.mxu1 %v912_v41 }
 0x138   :  { %859 = vmatprep.subr.bf16.mxu1 %v959_v0 }
 0x13b   :  { %860 = vmatpush3.bf16.msra.mxu1 %v913_v42 }
 0x1f1   :  { %v265_v61 = vpop.f32.mrb[0].mxu1 }
 0x1f2   :  { %v266_v62 = vadd.f32 %v726_v60, %v265_v61  ;;  %v823_v63 = vpop.f32.mrb[1].mxu1 }
 0x1f3   :  { %v268_v1 = vpop.f32.mrb[2].mxu1 }
 0x1f4   :  { %v273_v2 = vrot.slane %v266_v62, 4  ;;  %v280_v3 = vmul.f32 %v266_v62, %v266_v62  ;;  %v824_v4 = vpop.f32.mrb[3].mxu1 }
 0x1f6   :  { %v274_v5 = vadd.f32 %v273_v2, %v266_v62  ;;  %v281_v6 = vrot.slane %v280_v3, 4 }
 0x1f8   :  { %v275_v7 = vrot.slane %v274_v5, 2  ;;  %v282_v8 = vadd.f32 %v281_v6, %v280_v3 }
 0x1fa   :  { %v276_v9 = vadd.f32 %v275_v7, %v274_v5  ;;  %v283_v10 = vrot.slane %v282_v8, 2  ;;  %v418_v5 = vld [vmem:[%s1140_s5 + $0x6] sm:$0x1] }
 0x1fc   :  { %v277_v11 = vrot.slane %v276_v9, 1  ;;  %v284_v12 = vadd.f32 %v283_v10, %v282_v8  ;;  %v419_v8 = vld [vmem:[%s1140_s5 + $0xa] sm:$0x1] }
 0x1fe   :  { %v278_v13 = vadd.f32 %v277_v11, %v276_v9  ;;  %v285_v14 = vrot.slane %v284_v12, 1 }
 0x200   :  { %v279_v15 = vmul.f32 0.125, %v278_v13  ;;  %v286_v16 = vadd.f32 %v285_v14, %v284_v12 }
 0x202   :  { %v287_v17 = vmul.f32 0.125, %v286_v16  ;;  %v288_v18 = vmul.f32 %v279_v15, %v279_v15 }
 0x204   :  { %v289_v19 = vsub.f32 %v287_v17, %v288_v18  ;;  %v914_v17 = vld [vmem:[%s1138_s3] sm:$0xff]   ;;  %v915_v18 = vld [vmem:[%s1138_s3 + $0x8] sm:$0xff]  }
 0x206   :  { %v290_v20 = vmax.f32 %v289_v19, 0.0  ;;  %v916_v19 = vld [vmem:[%s1138_s3 + $0x10] sm:$0xff]  }
 0x208   :  { %v291_v21 = vadd.f32 1e-05, %v290_v20  ;;  %v917_v20 = vld [vmem:[%s1138_s3 + $0x18] sm:$0xff]  }
 0x20a   :  { %924 = vrsqrt.f32 %v291_v21  ;;  %v918_v21 = vld [vmem:[%s1138_s3 + $0x20] sm:$0xff]  }
 0x214   :  { %v925_v23 = vpop.eup %924 }
 0x215   :  { %v293_v24 = vmul.f32 %v925_v23, %v271_v22  ;;  %v919_v22 = vld [vmem:[%s1138_s3 + $0x28] sm:$0xff]   ;;  %v920_v23 = vld [vmem:[%s1138_s3 + $0x30] sm:$0xff]  }
 0x217   :  { %v299_v26 = vrot.slane %v293_v24, %v1038_v40  ;;  %v294_v27 = vmul.f32 %v293_v24, %v279_v15  ;;  %v921_v24 = vld [vmem:[%s1138_s3 + $0x38] sm:$0xff]  }
 0x219   :  { %v295_v28 = vsub.f32 %v272_v25, %v294_v27  ;;  %v300_v29 = vmul.f32 %v299_v26, %v266_v62  ;;  %v744_v25 = vld [vmem:[%s1140_s5 + $0x3] ss:$0 sm:$0xff] }
 0x21b   :  { %v304_v30 = vrot.slane %v295_v28, %v1038_v40 }
 0x21d   :  { %v305_v31 = vadd.f32 %v304_v30, %v300_v29 }
 0x21f   :  { %v306_v32 = vmax.f32 %v305_v31, 0.0 }
 0x221   :  { %v307_v33 = vpack.c.bf16 %v306_v32, %v306_v32 }
 0x223   :  { %842 = vmatmul.mubr.bf16.vlgmr.msra.gmra.mrb[4].mxu0 %v307_v33 }
 0x224   :  { %881 = vmatprep.mubr.msk.bf16.mxu0 %vm960_vm0, %v959_v0  ;;  %866 = vmatpush3.bf16.msra.mxu0 %v914_v17 }
 0x225   :  { %867 = vmatprep.subr.bf16.mxu0 %v959_v0 }
 0x228   :  { %868 = vmatpush3.bf16.msra.mxu0 %v915_v18 }
 0x229   :  { %869 = vmatprep.subr.bf16.mxu0 %v959_v0 }
 0x22c   :  { %870 = vmatpush3.bf16.msra.mxu0 %v916_v19 }
 0x22d   :  { %871 = vmatprep.subr.bf16.mxu0 %v959_v0 }
 0x230   :  { %872 = vmatpush3.bf16.msra.mxu0 %v917_v20 }
 0x231   :  { %873 = vmatprep.subr.bf16.mxu0 %v959_v0 }
 0x234   :  { %874 = vmatpush3.bf16.msra.mxu0 %v918_v21 }
 0x235   :  { %875 = vmatprep.subr.bf16.mxu0 %v959_v0 }
 0x238   :  { %876 = vmatpush3.bf16.msra.mxu0 %v919_v22 }
 0x239   :  { %877 = vmatprep.subr.bf16.mxu0 %v959_v0 }
 0x23c   :  { %878 = vmatpush3.bf16.msra.mxu0 %v920_v23 }
 0x23d   :  { %879 = vmatprep.subr.bf16.mxu0 %v959_v0 }
 0x240   :  { %880 = vmatpush3.bf16.msra.mxu0 %v921_v24 }
 0x2f6   :  { %v412_v44 = vpop.f32.mrb[4].mxu0 }
 0x2f7   :  { %v413_v45 = vadd.f32 %v735_v43, %v412_v44  ;;  %v843_v46 = vpop.f32.mrb[5].mxu0 }
 0x2f8   :  { %v415_v47 = vpop.f32.mrb[6].mxu0 }
 0x2f9   :  { %v420_v48 = vrot.slane %v413_v45, 4  ;;  %v427_v49 = vmul.f32 %v413_v45, %v413_v45  ;;  %v844_v50 = vpop.f32.mrb[7].mxu0 }
 0x2fa   :  { %v565_v50 = vld [vmem:[%s1140_s5 + $0x7] sm:$0x1] }
 0x2fb   :  { %v421_v51 = vadd.f32 %v420_v48, %v413_v45  ;;  %v428_v52 = vrot.slane %v427_v49, 4 }
 0x2fd   :  { %v422_v53 = vrot.slane %v421_v51, 2  ;;  %v429_v54 = vadd.f32 %v428_v52, %v427_v49 }
 0x2ff   :  { %v423_v55 = vadd.f32 %v422_v53, %v421_v51  ;;  %v430_v56 = vrot.slane %v429_v54, 2  ;;  %v566_v53 = vld [vmem:[%s1140_s5 + $0xb] sm:$0x1] }
 0x301   :  { %v424_v57 = vrot.slane %v423_v55, 1  ;;  %v431_v58 = vadd.f32 %v430_v56, %v429_v54 }
 0x303   :  { %v425_v59 = vadd.f32 %v424_v57, %v423_v55  ;;  %v432_v60 = vrot.slane %v431_v58, 1 }
 0x305   :  { %v426_v61 = vmul.f32 0.125, %v425_v59  ;;  %v433_v62 = vadd.f32 %v432_v60, %v431_v58 }
 0x307   :  { %v434_v63 = vmul.f32 0.125, %v433_v62  ;;  %v435_v1 = vmul.f32 %v426_v61, %v426_v61  ;;  %v753_v62 = vld [vmem:[%s1139_s4] ss:$0 sm:$0xff] }
 0x309   :  { %v436_v2 = vsub.f32 %v434_v63, %v435_v1 }
 0x30b   :  { %v437_v3 = vmax.f32 %v436_v2, 0.0 }
 0x30d   :  { %v438_v4 = vadd.f32 1e-05, %v437_v3 }
 0x30f   :  { %926 = vrsqrt.f32 %v438_v4 }
 0x319   :  { %v927_v6 = vpop.eup %926 }
 0x31a   :  { %v440_v7 = vmul.f32 %v927_v6, %v418_v5 }
 0x31c   :  { %v446_v9 = vrot.slane %v440_v7, %v1038_v40  ;;  %v441_v10 = vmul.f32 %v440_v7, %v426_v61 }
 0x31e   :  { %v442_v11 = vsub.f32 %v419_v8, %v441_v10  ;;  %v447_v12 = vmul.f32 %v446_v9, %v413_v45 }
 0x320   :  { %v451_v13 = vrot.slane %v442_v11, %v1038_v40 }
 0x322   :  { %v452_v14 = vadd.f32 %v451_v13, %v447_v12 }
 0x324   :  { %v453_v15 = vmax.f32 %v452_v14, 0.0 }
 0x326   :  { %v454_v16 = vpack.c.bf16 %v453_v15, %v453_v15 }
 0x328   :  { %862 = vmatmul.mubr.bf16.vlgmr.msra.gmra.mrb[4].mxu1 %v454_v16 }
 0x3fb   :  { %v559_v26 = vpop.f32.mrb[4].mxu1 }
 0x3fc   :  { %v560_v27 = vadd.f32 %v744_v25, %v559_v26  ;;  %v863_v28 = vpop.f32.mrb[5].mxu1 }
 0x3fd   :  { %v562_v29 = vpop.f32.mrb[6].mxu1 }
 0x3fe   :  { %v567_v30 = vrot.slane %v560_v27, 4  ;;  %v574_v31 = vmul.f32 %v560_v27, %v560_v27  ;;  %v864_v32 = vpop.f32.mrb[7].mxu1 }
 0x400   :  { %v568_v33 = vadd.f32 %v567_v30, %v560_v27  ;;  %v575_v34 = vrot.slane %v574_v31, 4 }
 0x402   :  { %v569_v35 = vrot.slane %v568_v33, 2  ;;  %v576_v36 = vadd.f32 %v575_v34, %v574_v31 }
 0x404   :  { %v570_v37 = vadd.f32 %v569_v35, %v568_v33  ;;  %v577_v38 = vrot.slane %v576_v36, 2 }
 0x406   :  { %v571_v39 = vrot.slane %v570_v37, 1  ;;  %v578_v0 = vadd.f32 %v577_v38, %v576_v36 }
 0x408   :  { %v572_v41 = vadd.f32 %v571_v39, %v570_v37  ;;  %v579_v42 = vrot.slane %v578_v0, 1 }
 0x40a   :  { %v573_v43 = vmul.f32 0.125, %v572_v41  ;;  %v580_v44 = vadd.f32 %v579_v42, %v578_v0 }
 0x40c   :  { %v581_v45 = vmul.f32 0.125, %v580_v44  ;;  %v582_v46 = vmul.f32 %v573_v43, %v573_v43 }
 0x40e   :  { %v583_v47 = vsub.f32 %v581_v45, %v582_v46 }
 0x410   :  { %v584_v48 = vmax.f32 %v583_v47, 0.0 }
 0x412   :  { %v585_v49 = vadd.f32 1e-05, %v584_v48 }
 0x414   :  { %928 = vrsqrt.f32 %v585_v49 }
 0x41e   :  { %v929_v51 = vpop.eup %928 }
 0x41f   :  { %v587_v52 = vmul.f32 %v929_v51, %v565_v50 }
 0x421   :  { %v593_v54 = vrot.slane %v587_v52, %v1038_v40  ;;  %v588_v55 = vmul.f32 %v587_v52, %v573_v43 }
 0x423   :  { %v589_v56 = vsub.f32 %v566_v53, %v588_v55  ;;  %v594_v57 = vmul.f32 %v593_v54, %v560_v27 }
 0x425   :  { %v598_v58 = vrot.slane %v589_v56, %v1038_v40 }
 0x427   :  { %v599_v59 = vadd.f32 %v598_v58, %v594_v57 }
 0x429   :  { %v600_v60 = vmax.f32 %v599_v59, 0.0 }
 0x42b   :  { %v601_v61 = vpack.c.bf16 %v600_v60, %v600_v60 }
 0x42d   :  { %882 = vmatmul.mubr.bf16.vlgmr.msra.gmra.mrb[8].mxu0 %v601_v61 }
 0x500   :  { %v707_v63 = vpop.f32.mrb[8].mxu0 }
 0x501   :  { %v708_v1 = vadd.f32 %v753_v62, %v707_v63  ;;  %v883_v2 = vpop.f32.mrb[9].mxu0 }
 0x502   :  { %v710_v3 = vpop.f32.mrb[10].mxu0 }
 0x503   :  { %v713_v4 = vmul.f32 0.5, %v708_v1  ;;  %v884_v5 = vpop.f32.mrb[11].mxu0 }
 0x505   :  { %930 = vtanh.f32 %v713_v4 }
 0x50f   :  { %v931_v6 = vpop.eup %930 }
 0x510   :  { %v715_v7 = vmul.f32 0.5, %v931_v6 }
 0x512   :  { %v716_v8 = vadd.f32 0.5, %v715_v7 }
 0x514   :  { %717 = vst.msk [vmem:[%s1141_s6] sm:$0xff] %vm51_vm3, %v716_v8 }
 0x515   :  { %722 = vsyncpa [#allocation3], 1 }

</bundles_post_ra>
